<compile_context>
chip_gen: v7x
topology: tpu7x:2x2x1
jax: 0.10.0
libtpu: 0.0.40
codegen_flags: <defaults>
</compile_context>

<pallas_src>
import functools

import jax
import jax.numpy as jnp
import numpy as np
from jax.experimental import pallas as pl
from jax.experimental.pallas import tpu as pltpu


def _round_up(x, m):
    return (x + m - 1) // m * m


def _bprmf_kernel(u_ref, p_ref, n_ref, pred_ref, reg_ref):
    """One tile of TB samples.

    u_ref/p_ref/n_ref: (TB, D) gathered embedding rows (f32).
    pred_ref:          (2, TB)  row 0 = pos predictions, row 1 = neg predictions.
    reg_ref:           (8, 128) per-tile partials; lanes 0/1/2 hold
                       sum(u*u), sum(p*p), sum(n*n) for this tile.
    """
    u = u_ref[...]
    p = p_ref[...]
    n = n_ref[...]

    # Predictions: elementwise product + reduce over the latent dim, stored
    # lane-dense (samples along lanes).
    pred_ref[0, :] = jnp.sum(u * p, axis=-1)
    pred_ref[1, :] = jnp.sum(u * n, axis=-1)

    # Fused regularizer: per-tile partial sums of squares (one scalar triple per
    # tile, no cross-grid-step state -> grid axis can be "parallel").
    su = jnp.sum(u * u)
    sp = jnp.sum(p * p)
    sn = jnp.sum(n * n)
    col = jax.lax.broadcasted_iota(jnp.int32, (8, 128), 1)
    reg_ref[...] = (jnp.where(col == 0, su, 0.0)
                    + jnp.where(col == 1, sp, 0.0)
                    + jnp.where(col == 2, sn, 0.0))


@functools.partial(jax.jit, static_argnames=("tile",))
def bprmf_forward(u_index, pos_i_index, neg_i_index, user_emb, item_emb,
                  reg_rate, batch_size, *, tile=512):
    B = u_index.shape[0]
    D = user_emb.shape[1]

    # Row gather in the wrapper (XLA gather) -> dense (B, D) kernel inputs.
    # TODO(synk): out-of-range indices are clamped by jnp.take; nn.Embedding
    # would raise instead.
    u_e = jnp.take(user_emb, u_index.astype(jnp.int32), axis=0)
    p_e = jnp.take(item_emb, pos_i_index.astype(jnp.int32), axis=0)
    n_e = jnp.take(item_emb, neg_i_index.astype(jnp.int32), axis=0)

    # Tile selection: one full-batch tile (padded to a sublane multiple) for
    # small B, otherwise lane-aligned `tile`-sample blocks (multiple of 128).
    if B <= tile:
        TB = _round_up(max(B, 1), 8)
        B_pad = TB
    else:
        TB = tile
        B_pad = _round_up(B, TB)
    num_tiles = B_pad // TB

    if B_pad != B:
        pad = B_pad - B
        # Zero rows contribute 0 to predictions (sliced off below) and 0 to the
        # squared-norm partials, so padding does not change semantics.
        u_e = jnp.pad(u_e, ((0, pad), (0, 0)))
        p_e = jnp.pad(p_e, ((0, pad), (0, 0)))
        n_e = jnp.pad(n_e, ((0, pad), (0, 0)))

    pred, reg_part = pl.pallas_call(
        _bprmf_kernel,
        grid=(num_tiles,),
        in_specs=[
            pl.BlockSpec((TB, D), lambda i: (i, 0)),
            pl.BlockSpec((TB, D), lambda i: (i, 0)),
            pl.BlockSpec((TB, D), lambda i: (i, 0)),
        ],
        out_specs=[
            pl.BlockSpec((2, TB), lambda i: (0, i)),     # lane-dense predictions
            pl.BlockSpec((8, 128), lambda i: (i, 0)),    # per-tile reg partials
        ],
        out_shape=[
            jax.ShapeDtypeStruct((2, B_pad), jnp.float32),
            jax.ShapeDtypeStruct((num_tiles * 8, 128), jnp.float32),
        ],
        compiler_params=pltpu.CompilerParams(
            dimension_semantics=("parallel",)),
    )(u_e, p_e, n_e)

    pos_pred = pred[0, :B]
    neg_pred = pred[1, :B]

    parts = reg_part.reshape(num_tiles, 8, 128)[:, 0, :3]     # (num_tiles, 3)
    sums = jnp.sum(parts, axis=0)
    reg_loss = (reg_rate * 0.5
                * (jnp.sqrt(sums[0]) + jnp.sqrt(sums[1]) + jnp.sqrt(sums[2]))
                / batch_size)
    return pos_pred, neg_pred, reg_loss


def truncated_normal_init(key, shape, std=0.01):
    # Deterministic analogue of the module's truncated_normal_ (clip at +-2 std).
    return jax.random.truncated_normal(key, -2.0, 2.0, shape, jnp.float32) * std


def _reference(u_index, pos_i_index, neg_i_index, user_emb, item_emb,
               reg_rate, batch_size):
    u_e = user_emb[u_index]
    p_e = item_emb[pos_i_index]
    n_e = item_emb[neg_i_index]
    pos = (u_e * p_e).sum(axis=1)
    neg = (u_e * n_e).sum(axis=1)
    reg = reg_rate * 0.5 * (jnp.linalg.norm(u_e) + jnp.linalg.norm(p_e)
                            + jnp.linalg.norm(n_e)) / batch_size
    return pos, neg, reg


if __name__ == "__main__":
    user_num, item_num, latent_dim = 64, 128, 32
    reg_rate = 0.01

    root = jax.random.PRNGKey(0)
    k_u, k_i, k_b = jax.random.split(root, 3)
    user_emb = truncated_normal_init(k_u, (user_num, latent_dim))
    item_emb = truncated_normal_init(k_i, (item_num, latent_dim))

    # batch=8 exercises the single-tile path; batch=900 exercises the
    # multi-tile (TB=512, padded to 1024) "parallel" path.
    for batch in (8, 900):
        k1, k2, k3 = jax.random.split(jax.random.fold_in(k_b, batch), 3)
        u_index = jax.random.randint(k1, (batch,), 0, user_num, dtype=jnp.int32)
        pos_i_index = jax.random.randint(k2, (batch,), 0, item_num, dtype=jnp.int32)
        neg_i_index = jax.random.randint(k3, (batch,), 0, item_num, dtype=jnp.int32)

        pos_pred, neg_pred, reg_loss = jax.block_until_ready(
            bprmf_forward(u_index, pos_i_index, neg_i_index,
                          user_emb, item_emb, reg_rate, batch))

        pos_ref, neg_ref, reg_ref = _reference(u_index, pos_i_index, neg_i_index,
                                               user_emb, item_emb, reg_rate, batch)

        np.testing.assert_allclose(np.asarray(pos_pred), np.asarray(pos_ref),
                                   rtol=1e-5, atol=1e-6)
        np.testing.assert_allclose(np.asarray(neg_pred), np.asarray(neg_ref),
                                   rtol=1e-5, atol=1e-6)
        np.testing.assert_allclose(float(reg_loss), float(reg_ref),
                                   rtol=1e-5, atol=1e-7)

    print("KERNEL_OK")
</pallas_src>

<mosaic_0001>
module attributes {stable_mosaic.version = 11 : i64} {
  func.func @_bprmf_kernel(%arg0: i32, %arg1: memref<8x32xf32, #tpu.memory_space<vmem>>, %arg2: memref<8x32xf32, #tpu.memory_space<vmem>>, %arg3: memref<8x32xf32, #tpu.memory_space<vmem>>, %arg4: memref<2x8xf32, #tpu.memory_space<vmem>>, %arg5: memref<8x128xf32, #tpu.memory_space<vmem>>) attributes {dimension_semantics = [#tpu.dimension_semantics<parallel>], iteration_bounds = array<i64: 1>, scalar_prefetch = 0 : i64, scratch_operands = 0 : i64, tpu.core_type = #tpu.core_type<tc>, window_params = [{transform_indices = @transform_0, window_bounds = array<i64: 8, 32>}, {transform_indices = @transform_1, window_bounds = array<i64: 8, 32>}, {transform_indices = @transform_2, window_bounds = array<i64: 8, 32>}, {transform_indices = @transform_3, window_bounds = array<i64: 2, 8>}, {transform_indices = @transform_4, window_bounds = array<i64: 8, 128>}]} {
    %c0 = arith.constant 0 : index
    %c0_0 = arith.constant 0 : index
    %0 = vector.load %arg1[%c0, %c0_0] : memref<8x32xf32, #tpu.memory_space<vmem>>, vector<8x32xf32>
    %c0_1 = arith.constant 0 : index
    %c0_2 = arith.constant 0 : index
    %1 = vector.load %arg2[%c0_1, %c0_2] : memref<8x32xf32, #tpu.memory_space<vmem>>, vector<8x32xf32>
    %c0_3 = arith.constant 0 : index
    %c0_4 = arith.constant 0 : index
    %2 = vector.load %arg3[%c0_3, %c0_4] : memref<8x32xf32, #tpu.memory_space<vmem>>, vector<8x32xf32>
    %3 = arith.mulf %0, %1 : vector<8x32xf32>
    %cst = arith.constant dense<0.000000e+00> : vector<8xf32>
    %4 = vector.multi_reduction <add>, %3, %cst [1] : vector<8x32xf32> to vector<8xf32>
    %c0_5 = arith.constant 0 : index
    %c0_6 = arith.constant 0 : index
    %5 = vector.load %arg4[%c0_5, %c0_6] : memref<2x8xf32, #tpu.memory_space<vmem>>, vector<1x8xf32>
    %6 = vector.shape_cast %5 : vector<1x8xf32> to vector<8xf32>
    %7 = vector.shape_cast %4 : vector<8xf32> to vector<1x8xf32>
    tpu.vector_store %arg4[%c0_5, %c0_6], %7 {strides = array<i32>} : memref<2x8xf32, #tpu.memory_space<vmem>>, vector<1x8xf32>,
    %8 = arith.mulf %0, %2 : vector<8x32xf32>
    %cst_7 = arith.constant dense<0.000000e+00> : vector<8xf32>
    %9 = vector.multi_reduction <add>, %8, %cst_7 [1] : vector<8x32xf32> to vector<8xf32>
    %c1 = arith.constant 1 : index
    %c0_8 = arith.constant 0 : index
    %10 = vector.load %arg4[%c1, %c0_8] : memref<2x8xf32, #tpu.memory_space<vmem>>, vector<1x8xf32>
    %11 = vector.shape_cast %10 : vector<1x8xf32> to vector<8xf32>
    %12 = vector.shape_cast %9 : vector<8xf32> to vector<1x8xf32>
    tpu.vector_store %arg4[%c1, %c0_8], %12 {strides = array<i32>} : memref<2x8xf32, #tpu.memory_space<vmem>>, vector<1x8xf32>,
    %13 = arith.mulf %0, %0 : vector<8x32xf32>
    %14 = vector.shape_cast %13 : vector<8x32xf32> to vector<1x8x32xf32>
    %cst_9 = arith.constant dense<0.000000e+00> : vector<1xf32>
    %15 = vector.multi_reduction <add>, %14, %cst_9 [1, 2] : vector<1x8x32xf32> to vector<1xf32>
    %16 = vector.shape_cast %15 : vector<1xf32> to vector<1x1x1xf32>
    %17 = vector.extract %16[0, 0, 0] : f32 from vector<1x1x1xf32>
    %18 = arith.mulf %1, %1 : vector<8x32xf32>
    %19 = vector.shape_cast %18 : vector<8x32xf32> to vector<1x8x32xf32>
    %cst_10 = arith.constant dense<0.000000e+00> : vector<1xf32>
    %20 = vector.multi_reduction <add>, %19, %cst_10 [1, 2] : vector<1x8x32xf32> to vector<1xf32>
    %21 = vector.shape_cast %20 : vector<1xf32> to vector<1x1x1xf32>
    %22 = vector.extract %21[0, 0, 0] : f32 from vector<1x1x1xf32>
    %23 = arith.mulf %2, %2 : vector<8x32xf32>
    %24 = vector.shape_cast %23 : vector<8x32xf32> to vector<1x8x32xf32>
    %cst_11 = arith.constant dense<0.000000e+00> : vector<1xf32>
    %25 = vector.multi_reduction <add>, %24, %cst_11 [1, 2] : vector<1x8x32xf32> to vector<1xf32>
    %26 = vector.shape_cast %25 : vector<1xf32> to vector<1x1x1xf32>
    %27 = vector.extract %26[0, 0, 0] : f32 from vector<1x1x1xf32>
    %28 = tpu.iota {dimensions = array<i32: 1>} : vector<8x128xi32>
    %c0_i32 = arith.constant 0 : i32
    %29 = vector.broadcast %c0_i32 : i32 to vector<8x128xi32>
    %30 = arith.cmpi eq, %28, %29 : vector<8x128xi32>
    %cst_12 = arith.constant 0.000000e+00 : f32
    %31 = vector.broadcast %17 : f32 to vector<8x128xf32>
    %32 = vector.broadcast %cst_12 : f32 to vector<8x128xf32>
    %33 = arith.select %30, %31, %32 : vector<8x128xi1>, vector<8x128xf32>
    %c1_i32 = arith.constant 1 : i32
    %34 = vector.broadcast %c1_i32 : i32 to vector<8x128xi32>
    %35 = arith.cmpi eq, %28, %34 : vector<8x128xi32>
    %cst_13 = arith.constant 0.000000e+00 : f32
    %36 = vector.broadcast %22 : f32 to vector<8x128xf32>
    %37 = vector.broadcast %cst_13 : f32 to vector<8x128xf32>
    %38 = arith.select %35, %36, %37 : vector<8x128xi1>, vector<8x128xf32>
    %39 = arith.addf %33, %38 : vector<8x128xf32>
    %c2_i32 = arith.constant 2 : i32
    %40 = vector.broadcast %c2_i32 : i32 to vector<8x128xi32>
    %41 = arith.cmpi eq, %28, %40 : vector<8x128xi32>
    %cst_14 = arith.constant 0.000000e+00 : f32
    %42 = vector.broadcast %27 : f32 to vector<8x128xf32>
    %43 = vector.broadcast %cst_14 : f32 to vector<8x128xf32>
    %44 = arith.select %41, %42, %43 : vector<8x128xi1>, vector<8x128xf32>
    %45 = arith.addf %39, %44 : vector<8x128xf32>
    %c0_15 = arith.constant 0 : index
    %c0_16 = arith.constant 0 : index
    %46 = vector.load %arg5[%c0_15, %c0_16] : memref<8x128xf32, #tpu.memory_space<vmem>>, vector<8x128xf32>
    tpu.vector_store %arg5[%c0_15, %c0_16], %45 {strides = array<i32>} : memref<8x128xf32, #tpu.memory_space<vmem>>, vector<8x128xf32>,
    return
  }
  func.func @transform_0(%arg0: i32) -> (i32, i32) {
    %c0_i32 = arith.constant 0 : i32
    %c0_i32_0 = arith.constant 0 : i32
    return %arg0, %c0_i32 : i32, i32
  }
  func.func @transform_1(%arg0: i32) -> (i32, i32) {
    %c0_i32 = arith.constant 0 : i32
    %c0_i32_0 = arith.constant 0 : i32
    return %arg0, %c0_i32 : i32, i32
  }
  func.func @transform_2(%arg0: i32) -> (i32, i32) {
    %c0_i32 = arith.constant 0 : i32
    %c0_i32_0 = arith.constant 0 : i32
    return %arg0, %c0_i32 : i32, i32
  }
  func.func @transform_3(%arg0: i32) -> (i32, i32) {
    %c0_i32 = arith.constant 0 : i32
    %c0_i32_0 = arith.constant 0 : i32
    return %c0_i32, %arg0 : i32, i32
  }
  func.func @transform_4(%arg0: i32) -> (i32, i32) {
    %c0_i32 = arith.constant 0 : i32
    %c0_i32_0 = arith.constant 0 : i32
    return %arg0, %c0_i32 : i32, i32
  }
}

</mosaic_0001>

<bundles_post_ra>
// kernel: bprmf_forward.1
= control target key start
LH: loop header
LB: loop body
LE: loop exit
PB: predicated region body
PF: predicated region fallthrough
CT: control target
= control target key end

     0   :  { %vm20_vm0 = vcmask 261120   ;;  %v25_v13 = vlaneseq  ;;  %vm32_vm1 = vcmask 57344   ;;  %s154_s2 = inlined_call_operand.vmem [shape: f32[8,32], index: 2, kind: input, shape index: {}]   ;;  %s155_s0 = inlined_call_operand.vmem [shape: f32[8,32], index: 0, kind: input, shape index: {}]   ;;  %s156_s1 = inlined_call_operand.vmem [shape: f32[8,32], index: 1, kind: input, shape index: {}]   ;;  %s157_s3 = inlined_call_operand.vmem [shape: f32[2,8], index: 3, kind: output, shape index: {0}]   ;;  %s158_s4 = inlined_call_operand.vmem [shape: f32[8,128], index: 4, kind: output, shape index: {1}]  }
   0x1   :  { %v18_v0 = vld [vmem:[%s154_s2] sm:$0xff] }
   0x2   :  { %v16_v1 = vld [vmem:[%s155_s0] sm:$0xff]  ;;  %v67_v3 = vmul.f32 %v18_v0, %v18_v0  ;;  %v28_v14 = vshrl.u32 %v25_v13, 7  ;;  %v26_v15 = vand.u32 127, %v25_v13 }
   0x3   :  { %v17_v2 = vld [vmem:[%s156_s1] sm:$0xff]  ;;  %v45_v4 = vmul.f32 %v16_v1, %v16_v1  ;;  %v34_v10 = vmul.f32 %v18_v0, %v16_v1 }
   0x4   :  { %v56_v5 = vmul.f32 %v17_v2, %v17_v2  ;;  %v19_v6 = vmul.f32 %v17_v2, %v16_v1  ;;  %v68_v7 = vsel %vm20_vm0, %v67_v3, 0.0  ;;  %v29_v20 = vsub.s32 %v26_v15, %v28_v14 }
   0x5   :  { %v46_v8 = vsel %vm20_vm0, %v45_v4, 0.0  ;;  %69 = vadd.xlane.f32.xlu1 %v68_v7  ;;  %v35_v12 = vsel %vm20_vm0, %v34_v10, 0.0  ;;  %vm78_vm2 = vcmp.eq.s32.totalorder %v26_v15, 0  ;;  %vm81_vm3 = vcmp.eq.s32.totalorder %v26_v15, 1 }
   0x6   :  { %47 = vadd.xlane.f32.xlu0 %v46_v8  ;;  %v57_v9 = vsel %vm20_vm0, %v56_v5, 0.0  ;;  %v21_v11 = vsel %vm20_vm0, %v19_v6, 0.0  ;;  %vm85_vm4 = vcmp.eq.s32.totalorder %v26_v15, 2 }
   0x9   :  { %22 = vadd.xlane.f32.xlu1 %v21_v11 }
   0xa   :  { %58 = vadd.xlane.f32.xlu0 %v57_v9 }
   0xe   :  { %36 = vadd.xlane.f32.xlu0 %v35_v12 }
  0x92   :  { %v70_v16 = vpop.xlane.xlu1 %69 }
  0x93   :  { %v48_v17 = vpop.xlane.xlu0 %47  ;;  %v71_v18 = vrot.slane %v70_v16, 4 }
  0x94   :  { %v49_v19 = vrot.slane %v48_v17, 4 }
  0x95   :  { %v72_v21 = vadd.f32 %v71_v18, %v70_v16 }
  0x96   :  { %v50_v22 = vadd.f32 %v49_v19, %v48_v17  ;;  %v23_v24 = vpop.xlane.xlu1 %22 }
  0x97   :  { %v59_v23 = vpop.xlane.xlu0 %58  ;;  %v73_v25 = vrot.slane %v72_v21, 2  ;;  %v30_v28 = vrot.slane %v23_v24, %v29_v20 }
  0x98   :  { %v51_v26 = vrot.slane %v50_v22, 2  ;;  %v60_v27 = vrot.slane %v59_v23, 4 }
  0x99   :  { %33 = vst.msk [vmem:[%s157_s3] sm:$0x1] %vm32_vm1, %v30_v28  ;;  %v74_v31 = vadd.f32 %v73_v25, %v72_v21 }
  0x9a   :  { %v61_v29 = vadd.f32 %v60_v27, %v59_v23  ;;  %v52_v30 = vadd.f32 %v51_v26, %v50_v22 }
  0x9b   :  { %v37_v32 = vpop.xlane.xlu0 %36  ;;  %v75_v38 = vrot.slane %v74_v31, 1 }
  0x9c   :  { %v62_v33 = vrot.slane %v61_v29, 2  ;;  %v53_v34 = vrot.slane %v52_v30, 1  ;;  %v42_v35 = vrot.slane %v37_v32, %v29_v20 }
  0x9d   :  { %v76_v41 = vadd.f32 %v75_v38, %v74_v31 }
  0x9e   :  { %v54_v36 = vadd.f32 %v53_v34, %v52_v30  ;;  %v63_v37 = vadd.f32 %v62_v33, %v61_v29  ;;  %44 = vst.msk [vmem:[%s157_s3 + $0x1] sm:$0x1] %vm32_vm1, %v42_v35 }
  0xa0   :  { %98 = vpush %v54_v36  ;;  %v64_v39 = vrot.slane %v63_v37, 1 }
  0xa2   :  { %v65_v40 = vadd.f32 %v64_v39, %v63_v37 }
  0xa4   :  { %100 = vpush %v65_v40 }
  0xa5   :  { %102 = vpush %v76_v41 }
  0xd1   :  { %s99_s22 = spop %98 }
  0xd2   :  { %v79_v42 = vstv %s99_s22 }
  0xd3   :  { %v80_v44 = vsel %vm78_vm2, %v79_v42, 0.0 }
  0xd5   :  { %s101_s23 = spop %100 }
  0xd6   :  { %v82_v43 = vstv %s101_s23  ;;  %s103_s24 = spop %102 }
  0xd7   :  { %v83_v45 = vsel %vm81_vm3, %v82_v43, 0.0  ;;  %v86_v46 = vstv %s103_s24 }
  0xd8   :  { %v84_v47 = vadd.f32 %v83_v45, %v80_v44  ;;  %v87_v48 = vsel %vm85_vm4, %v86_v46, 0.0 }
  0xda   :  { %v88_v49 = vadd.f32 %v87_v48, %v84_v47 }
  0xdc   :  { %89 = vst [vmem:[%s158_s4] sm:$0xff] %v88_v49 }

</bundles_post_ra>
